<compile_context>
chip_gen: v6e
topology: v6e:2x2x1
jax: 0.10.0
libtpu: 0.0.40
codegen_flags: <defaults>
</compile_context>

<pallas_src>
import functools

import jax
import jax.numpy as jnp
from jax.experimental import pallas as pl
from jax.experimental.pallas import tpu as pltpu

LANES = 128        # vreg lane width
SUBLANES = 8       # f32 sublanes per vreg
CHUNK_ROWS = 256   # rows per in-kernel reduction chunk (32 f32 vregs of values)


def _cdiv(a, b):
    return (a + b - 1) // b


def _chip_profile():
    """Returns (block_bytes, num_tensorcores) for the local chip generation."""
    kind = ""
    try:
        kind = jax.devices()[0].device_kind.lower()
    except Exception:
        pass
    if "v7" in kind:
        # 8 MiB blocks x2 pipeline buffers = 16 MiB: within v7x's 32 MiB scoped
        # VMEM default (64 MiB physical).  2 TensorCores per chip.
        return 8 << 20, 2
    # v5e (16 MiB scoped default) / v6e (32 MiB): 4 MiB x2 = 8 MiB fits both.
    return 4 << 20, 1


def _elementwise(x, mode, target_val, sign):
    """Per-element loss term (f32 in, f32 out). mode/target_val/sign are static."""
    if mode == "vanilla":
        # BCEWithLogits vs constant target t: max(x,0) - x*t + log(1 + exp(-|x|))
        # NOTE: exp+log1p per element -> EUP-bound mode (single EUP per TC); kept
        # in f32 for accuracy.  On v7x the dual-TC split doubles EUP throughput.
        t = target_val
        return jnp.maximum(x, 0.0) - x * t + jnp.log1p(jnp.exp(-jnp.abs(x)))
    elif mode == "lsgan":
        d = x - target_val
        return d * d
    elif mode == "wgan":
        return sign * x                       # mean(sign*x); sign=-1 real, +1 fake
    elif mode == "wgan_softplus":
        z = sign * x                          # softplus(sign*x), numerically stable
        return jnp.maximum(z, 0.0) + jnp.log1p(jnp.exp(-jnp.abs(z)))
    elif mode == "hinge_disc":
        return jnp.maximum(1.0 + sign * x, 0.0)
    elif mode == "hinge_gen":
        return -x
    else:
        raise NotImplementedError(f"mode {mode}")


def _sum_kernel(x_ref, o_ref, *, mode, target_val, sign,
                rows, block_rows, blocks_per_core, needs_mask):
    c = pl.program_id(0)   # leading axis: CORE_PARALLEL on v7x, size-1 elsewhere
    i = pl.program_id(1)   # "arbitrary" reduction axis

    # Output block (8, 128) is resident across the reduction axis -> accumulator.
    @pl.when(i == 0)
    def _init():
        o_ref[...] = jnp.zeros_like(o_ref)

    gidx = c * blocks_per_core + i             # unclamped global block index

    full_chunks = block_rows // CHUNK_ROWS
    rem_rows = block_rows - full_chunks * CHUNK_ROWS   # multiple of SUBLANES

    def _block_sum(apply_mask):
        def chunk_val(start, crows):
            # Load / upcast / transform one chunk, fold it to one vreg (8, 128)
            # with pure VPU adds.  The cross-lane reduce happens in the wrapper.
            xc = x_ref[pl.ds(start, crows), :].astype(jnp.float32)
            v = _elementwise(xc, mode, target_val, sign)
            if apply_mask:
                # Mask rows past the end of the data (partial last block / dead
                # block from the core split).  Row-index based int32 math: fine
                # for any tensor < ~1 TB.  Must stay a select, not a *0 -- the
                # dead rows read unspecified VMEM (possibly NaN/Inf).
                row = (jax.lax.broadcasted_iota(jnp.int32, v.shape, 0)
                       + gidx * block_rows + start)
                v = jnp.where(row < rows, v, 0.0)
            return jnp.sum(v.reshape(crows // SUBLANES, SUBLANES, LANES), axis=0)

        acc = jnp.zeros((SUBLANES, LANES), jnp.float32)
        if full_chunks == 1:
            acc = acc + chunk_val(0, CHUNK_ROWS)
        elif full_chunks > 1:
            def body(j, a):
                start = pl.multiple_of(j * CHUNK_ROWS, CHUNK_ROWS)
                return a + chunk_val(start, CHUNK_ROWS)
            unroll = True if full_chunks <= 16 else 8
            acc = jax.lax.fori_loop(0, full_chunks, body, acc, unroll=unroll)
        if rem_rows:
            acc = acc + chunk_val(full_chunks * CHUNK_ROWS, rem_rows)
        return acc

    if not needs_mask:                         # static: every block is full
        o_ref[...] += _block_sum(False)
    else:
        is_edge = (gidx + 1) * block_rows > rows   # block extends past valid rows

        @pl.when(is_edge)
        def _edge():
            o_ref[...] += _block_sum(True)

        @pl.when(jnp.logical_not(is_edge))
        def _full():
            o_ref[...] += _block_sum(False)


def _gan_mean_pallas(x, mode, target_val=0.0, sign=1.0,
                     *, block_rows_cap=None, force_cores=None):
    """mean(elementwise(x)) over all elements of x, computed with a Pallas kernel."""
    n = int(x.size)
    if n == 0:
        return jnp.float32(0.0)
    tv, sg = float(target_val), float(sign)

    itemsize = jnp.dtype(x.dtype).itemsize
    block_bytes, chip_cores = _chip_profile()

    # Constant-byte blocks: sub-32-bit inputs get proportionally more rows.
    max_block_rows = block_bytes // (LANES * itemsize)
    if block_rows_cap is not None:               # test hook / manual cap
        max_block_rows = min(max_block_rows, int(block_rows_cap))
    max_block_rows = max(CHUNK_ROWS, (max_block_rows // CHUNK_ROWS) * CHUNK_ROWS)

    rows = n // LANES
    if rows >= max_block_rows:
        rows_k = rows                    # arbitrary row count; partial last block is masked
        block_rows = max_block_rows
    else:
        rows_k = (rows // SUBLANES) * SUBLANES   # small input: 8-aligned prefix, one block
        block_rows = rows_k
    n_k = rows_k * LANES

    # Ragged tail not covered by the kernel (< ~1.1K elements): tiny plain-JAX sum.
    tail_sum = None
    if n_k < n:
        tail = x.reshape(-1)[n_k:]
        tail_sum = jnp.sum(_elementwise(tail.astype(jnp.float32), mode, tv, sg))

    if rows_k == 0:                      # input smaller than one vreg row group
        return tail_sum / jnp.float32(n)

    if n_k == n:
        x2d = x.reshape(rows_k, LANES)                       # metadata-only, zero-copy
    else:
        # TODO(synk): the non-128-aligned case forces XLA to materialize the sliced
        # prefix (one extra HBM read+write); rare for NCHW GAN predictions.
        x2d = x.reshape(-1)[:n_k].reshape(rows_k, LANES)

    num_blocks = _cdiv(rows_k, block_rows)
    # Only split across a leading axis on chips that actually have 2 TensorCores.
    num_cores = force_cores if force_cores is not None else chip_cores
    num_cores = num_cores if num_blocks >= 2 else 1
    blocks_per_core = _cdiv(num_blocks, num_cores)
    needs_mask = (rows_k % block_rows != 0) or (num_cores * blocks_per_core != num_blocks)

    if num_cores * blocks_per_core == num_blocks:
        def in_index(c, i):
            return (c * blocks_per_core + i, 0)
    else:
        # Clamp dead blocks (odd block count split over 2 cores) onto the last real
        # block; the in-kernel mask zeroes their contribution.
        def in_index(c, i):
            return (jnp.minimum(c * blocks_per_core + i, num_blocks - 1), 0)

    if num_cores == 2 and chip_cores == 2:
        # Actually shard the leading axis across the two v7x TensorCores.
        core_par = getattr(pltpu, "CORE_PARALLEL", None)
        arb = getattr(pltpu, "ARBITRARY", "arbitrary")
        dim_sems = (core_par, arb) if core_par is not None else ("parallel", "arbitrary")
    else:
        dim_sems = ("arbitrary", "arbitrary")

    kernel = functools.partial(
        _sum_kernel, mode=mode, target_val=tv, sign=sg,
        rows=rows_k, block_rows=block_rows,
        blocks_per_core=blocks_per_core, needs_mask=needs_mask)

    trans_per_elem = 2 if mode in ("vanilla", "wgan_softplus") else 0
    cost = pl.CostEstimate(
        flops=4 * n_k,
        transcendentals=trans_per_elem * n_k,
        bytes_accessed=n_k * itemsize + num_cores * SUBLANES * LANES * 4)

    partials = pl.pallas_call(
        kernel,
        out_shape=jax.ShapeDtypeStruct((num_cores * SUBLANES, LANES), jnp.float32),
        grid_spec=pltpu.PrefetchScalarGridSpec(
            num_scalar_prefetch=0,
            grid=(num_cores, blocks_per_core),
            in_specs=[pl.BlockSpec((block_rows, LANES), in_index)],
            out_specs=pl.BlockSpec((SUBLANES, LANES), lambda c, i: (c, 0)),
        ),
        compiler_params=pltpu.CompilerParams(dimension_semantics=dim_sems),
        cost_estimate=cost,
    )(x2d)

    total = jnp.sum(partials)
    if tail_sum is not None:
        total = total + tail_sum
    return total / jnp.float32(n)


class GANLossPallas:
    """JAX/Pallas port of GANLoss.forward (no learnable parameters)."""

    SUPPORTED = ("vanilla", "lsgan", "wgan", "wgan_softplus", "hinge", "swd")

    def __init__(self, gan_type, real_label_val=1.0, fake_label_val=0.0, loss_weight=1.0):
        if gan_type not in self.SUPPORTED:
            raise NotImplementedError(f"GAN type {gan_type} is not implemented.")
        self.gan_type = gan_type
        self.real_label_val = float(real_label_val)
        self.fake_label_val = float(fake_label_val)
        self.loss_weight = float(loss_weight)

    def __call__(self, inp, target_is_real, is_disc=False):
        if self.gan_type == "swd":
            # TODO(synk): 'swd' path (Laplacian pyramids, unfold, randperm, sort,
            # random projections) has no clean single-kernel Pallas equivalent here.
            raise NotImplementedError("swd path not implemented in Pallas")

        if self.gan_type == "hinge":
            if is_disc:
                sign = -1.0 if target_is_real else 1.0
                loss = _gan_mean_pallas(inp, "hinge_disc", sign=sign)
            else:
                loss = _gan_mean_pallas(inp, "hinge_gen")
        elif self.gan_type in ("wgan", "wgan_softplus"):
            sign = -1.0 if target_is_real else 1.0
            loss = _gan_mean_pallas(inp, self.gan_type, sign=sign)
        else:  # vanilla / lsgan: constant target value
            t = self.real_label_val if target_is_real else self.fake_label_val
            loss = _gan_mean_pallas(inp, self.gan_type, target_val=t)

        return loss if is_disc else loss * self.loss_weight


if __name__ == "__main__":
    key = jax.random.PRNGKey(0)
    x = jax.random.normal(key, (2, 4, 16, 16), dtype=jnp.float32)  # NCHW
    xf = x.astype(jnp.float32)

    def ref_vanilla(v, t):
        return jnp.mean(jnp.maximum(v, 0.0) - v * t + jnp.log1p(jnp.exp(-jnp.abs(v))))

    checks = []

    # vanilla, generator, real target, loss_weight=2.0
    checks.append((GANLossPallas("vanilla", loss_weight=2.0)(x, True, is_disc=False),
                   ref_vanilla(xf, 1.0) * 2.0))
    # lsgan, discriminator, fake target
    checks.append((GANLossPallas("lsgan")(x, False, is_disc=True), jnp.mean(xf ** 2)))
    # wgan, discriminator, real -> -mean(x)
    checks.append((GANLossPallas("wgan")(x, True, is_disc=True), -jnp.mean(xf)))
    # wgan_softplus, discriminator, fake -> mean(softplus(x))
    checks.append((GANLossPallas("wgan_softplus")(x, False, is_disc=True),
                   jnp.mean(jax.nn.softplus(xf))))
    # hinge, discriminator, real -> mean(relu(1 - x))
    checks.append((GANLossPallas("hinge")(x, True, is_disc=True),
                   jnp.mean(jnp.maximum(1.0 - xf, 0.0))))
    # hinge, generator -> -mean(x) * loss_weight
    checks.append((GANLossPallas("hinge", loss_weight=0.5)(x, True, is_disc=False),
                   -jnp.mean(xf) * 0.5))

    # Non-128-aligned shape: single-block path + ragged plain-JAX tail.
    y = jax.random.normal(jax.random.PRNGKey(1), (2, 4, 132, 132), dtype=jnp.float32)
    checks.append((GANLossPallas("lsgan")(y, True, is_disc=True),
                   jnp.mean((y - 1.0) ** 2)))
    checks.append((GANLossPallas("vanilla")(y, False, is_disc=True),
                   ref_vanilla(y, 0.0)))

    # Forced small blocks + 2-way core split: exercises the multi-block grid, the
    # dead-block clamp, the masked partial last block, and the per-core accumulators.
    checks.append((_gan_mean_pallas(y, "lsgan", target_val=1.0,
                                    block_rows_cap=512, force_cores=2),
                   jnp.mean((y - 1.0) ** 2)))
    checks.append((_gan_mean_pallas(y, "hinge_disc", sign=-1.0, block_rows_cap=256),
                   jnp.mean(jnp.maximum(1.0 - y, 0.0))))

    # Larger tensor: exercises the big-block path with the chunked fori_loop
    # (unroll=8) and a masked partial trailing block at default block sizes.
    z = jax.random.normal(jax.random.PRNGKey(2), (2, 8, 256, 320), dtype=jnp.float32)
    checks.append((GANLossPallas("lsgan")(z, False, is_disc=True), jnp.mean(z ** 2)))
    checks.append((GANLossPallas("wgan")(z, True, is_disc=True), -jnp.mean(z)))

    # bf16 input stays bf16 on the wire (kernel upcasts internally; block byte
    # budget constant -> twice the rows per block).
    xb = x.astype(jnp.bfloat16)
    checks.append((GANLossPallas("lsgan")(xb, False, is_disc=True),
                   jnp.mean(xb.astype(jnp.float32) ** 2)))
    zb = z.astype(jnp.bfloat16)
    checks.append((GANLossPallas("hinge")(zb, False, is_disc=True),
                   jnp.mean(jnp.maximum(1.0 + zb.astype(jnp.float32), 0.0))))

    for got, want in checks:
        got = jax.block_until_ready(got)
        assert jnp.allclose(got, want, rtol=1e-4, atol=1e-6), (got, want)

    print("KERNEL_OK")
</pallas_src>

<mosaic_0001>
module attributes {stable_mosaic.version = 11 : i64} {
  func.func @_sum_kernel(%arg0: i32, %arg1: i32, %arg2: memref<16x128xf32, #tpu.memory_space<vmem>>, %arg3: memref<8x128xf32, #tpu.memory_space<vmem>>) attributes {dimension_semantics = [#tpu.dimension_semantics<arbitrary>, #tpu.dimension_semantics<arbitrary>], iteration_bounds = array<i64: 1, 1>, scalar_prefetch = 0 : i64, scratch_operands = 0 : i64, tpu.core_type = #tpu.core_type<tc>, window_params = [{transform_indices = @transform_0, window_bounds = array<i64: 16, 128>}, {transform_indices = @transform_1, window_bounds = array<i64: 8, 128>}]} {
    %c0_i32 = arith.constant 0 : i32
    %0 = arith.cmpi eq, %arg1, %c0_i32 : i32
    %1 = arith.extui %0 : i1 to i32
    %c0_i32_0 = arith.constant 0 : i32
    %2 = arith.cmpi ne, %1, %c0_i32_0 : i32
    scf.if %2 {
      %cst_10 = arith.constant 0.000000e+00 : f32
      %22 = vector.broadcast %cst_10 : f32 to vector<8x128xf32>
      %c0_11 = arith.constant 0 : index
      %c0_12 = arith.constant 0 : index
      %23 = vector.load %arg3[%c0_11, %c0_12] : memref<8x128xf32, #tpu.memory_space<vmem>>, vector<8x128xf32>
      tpu.vector_store %arg3[%c0_11, %c0_12], %22 {strides = array<i32>} : memref<8x128xf32, #tpu.memory_space<vmem>>, vector<8x128xf32>,
    } else {
    }
    %c0 = arith.constant 0 : index
    %c0_1 = arith.constant 0 : index
    %3 = vector.load %arg3[%c0, %c0_1] : memref<8x128xf32, #tpu.memory_space<vmem>>, vector<8x128xf32>
    %cst = arith.constant 0.000000e+00 : f32
    %4 = vector.broadcast %cst : f32 to vector<8x128xf32>
    %c0_2 = arith.constant 0 : index
    %c0_3 = arith.constant 0 : index
    %5 = vector.load %arg2[%c0_2, %c0_3] : memref<16x128xf32, #tpu.memory_space<vmem>>, vector<16x128xf32>
    %cst_4 = arith.constant 0.000000e+00 : f32
    %6 = vector.broadcast %cst_4 : f32 to vector<16x128xf32>
    %7 = arith.maximumf %5, %6 : vector<16x128xf32>
    %cst_5 = arith.constant 1.000000e+00 : f32
    %8 = vector.broadcast %cst_5 : f32 to vector<16x128xf32>
    %9 = arith.mulf %5, %8 : vector<16x128xf32>
    %10 = arith.subf %7, %9 : vector<16x128xf32>
    %11 = math.absf %5 : vector<16x128xf32>
    %cst_6 = arith.constant 0.000000e+00 : f32
    %12 = vector.broadcast %cst_6 : f32 to vector<16x128xf32>
    %13 = arith.subf %12, %11 : vector<16x128xf32>
    %14 = math.exp %13 : vector<16x128xf32>
    %15 = math.log1p %14 : vector<16x128xf32>
    %16 = arith.addf %10, %15 : vector<16x128xf32>
    %17 = vector.shape_cast %16 : vector<16x128xf32> to vector<2x8x128xf32>
    %cst_7 = arith.constant dense<0.000000e+00> : vector<8x128xf32>
    %18 = vector.multi_reduction <add>, %17, %cst_7 [0] : vector<2x8x128xf32> to vector<8x128xf32>
    %19 = arith.addf %4, %18 : vector<8x128xf32>
    %20 = arith.addf %3, %19 : vector<8x128xf32>
    %c0_8 = arith.constant 0 : index
    %c0_9 = arith.constant 0 : index
    %21 = vector.load %arg3[%c0_8, %c0_9] : memref<8x128xf32, #tpu.memory_space<vmem>>, vector<8x128xf32>
    tpu.vector_store %arg3[%c0_8, %c0_9], %20 {strides = array<i32>} : memref<8x128xf32, #tpu.memory_space<vmem>>, vector<8x128xf32>,
    return
  }
  func.func @transform_0(%arg0: i32, %arg1: i32) -> (i32, i32) {
    %c1_i32 = arith.constant 1 : i32
    %0 = arith.muli %arg0, %c1_i32 : i32
    %1 = arith.addi %0, %arg1 : i32
    %c0_i32 = arith.constant 0 : i32
    %c0_i32_0 = arith.constant 0 : i32
    return %1, %c0_i32 : i32, i32
  }
  func.func @transform_1(%arg0: i32, %arg1: i32) -> (i32, i32) {
    %c0_i32 = arith.constant 0 : i32
    %c0_i32_0 = arith.constant 0 : i32
    return %arg0, %c0_i32 : i32, i32
  }
}

</mosaic_0001>

<bundles_post_ra>
// kernel: tpu_custom_call.1
= control target key start
LH: loop header
LB: loop body
LE: loop exit
PB: predicated region body
PF: predicated region fallthrough
CT: control target
= control target key end

     0   :  { %6 = vsyncpa [#allocation3], 0  ;;  %s165_s0 = inlined_call_operand.hbm [shape: f32[16,128], index: 0, kind: input, shape index: {}]   ;;  %s166_s1 = inlined_call_operand.hbm [shape: f32[8,128], index: 1, kind: output, shape index: {}]  }
   0x1   :  { %7 = vsyncpa [#allocation4], 0  ;;  %s145_s6 = smov [#allocation2]  }
   0x2   :  { %s17_s7 = sshll.u32 %s145_s6, 4  ;;  %s18_s7 = int_to_ptr.vmem [resolvable:$true] %s17_s7 }
   0x3   :  { %s109_s8 = scalar_lea.vmem %s18_s7, 256  ;;  %p114_p1 = scmp.lt.s32.totalorder %s18_s7, %s18_s7 }
   0x4   :  { %p110_p0 = scmp.ne.s32.totalorder %s18_s7, %s109_s8  ;;  %p115_p2 = scmp.lt.s32.totalorder %s109_s8, %s109_s8 }
   0x6   :  { %p116_p3 = por %p115_p2, %p114_p1 }
   0x8   :  { %p117_p4 = pnand %p116_p3, %p110_p0 }
   0xa   :  { %120 = shalt.err (!%p117_p4)
}
   0xb   :  { %s146_s9 = smov 128   ;;  %s147_s10 = smov 8  }
   0xc   :  { %23 = dma.hbm_to_vmem [thread:$0]  %s165_s0, 256, %s18_s7, [#allocation3], %s146_s9, %s146_s9, %s147_s10  }
   0xd   :  { %141 = dma.done.wait [#allocation3], 256  }
   0xe   :  { %142 = vsyncadd [#allocation3], 4294967040  ;;  %v35_v0 = vld [vmem:[#allocation2] sm:$0xff]  ;;  %v36_v1 = vld [vmem:[#allocation2 + $0x8] sm:$0xff]  ;;  %s148_s0 = smov [#allocation5]  }
   0xf   :  { %v41_v2 = vand.u32 2147483647, %v35_v0  ;;  %v42_v3 = vand.u32 2147483647, %v36_v1  ;;  %v37_v15 = vmax.f32 %v35_v0, 0.0  ;;  %v38_v18 = vmax.f32 %v36_v1, 0.0 }
  0x10   :  { %s79_s13 = sshll.u32 %s148_s0, 4  ;;  %s80_s13 = int_to_ptr.vmem [resolvable:$true] %s79_s13 }
  0x11   :  { %v43_v4 = vsub.f32 0.0, %v41_v2  ;;  %v44_v5 = vsub.f32 0.0, %v42_v3  ;;  %v39_v22 = vsub.f32 %v37_v15, %v35_v0  ;;  %v40_v25 = vsub.f32 %v38_v18, %v36_v1  ;;  %s121_s14 = scalar_lea.vmem %s80_s13, 128  ;;  %p126_p6 = scmp.lt.s32.totalorder %s80_s13, %s80_s13 }
  0x12   :  { %p122_p5 = scmp.ne.s32.totalorder %s80_s13, %s121_s14  ;;  %p127_p7 = scmp.lt.s32.totalorder %s121_s14, %s121_s14 }
  0x13   :  { %v45_v6 = vmul.f32 1.442695, %v43_v4  ;;  %v47_v7 = vmul.f32 1.442695, %v44_v5 }
  0x14   :  { %p128_p8 = por %p127_p7, %p126_p6 }
  0x15   :  { %93 = vpow2.f32 %v45_v6 }
  0x16   :  { %95 = vpow2.f32 %v47_v7  ;;  %p129_p9 = pnand %p128_p8, %p122_p5 }
  0x22   :  { %v94_v8 = vpop.eup %93 }
  0x23   :  { %v96_v9 = vpop.eup %95  ;;  %v49_v10 = vadd.f32 1.0, %v94_v8  ;;  %v52_v12 = vmul.f32 -0.5, %v94_v8  ;;  %v55_v16 = vand.u32 2147483647, %v94_v8 }
  0x24   :  { %v58_v11 = vadd.f32 1.0, %v96_v9  ;;  %v61_v13 = vmul.f32 -0.5, %v96_v9  ;;  %v64_v19 = vand.u32 2147483647, %v96_v9 }
  0x25   :  { %97 = vlog2.f32 %v49_v10  ;;  %v53_v14 = vadd.f32 1.0, %v52_v12  ;;  %vm56_vm0 = vcmp.lt.f32.partialorder %v55_v16, 0.0004427343 }
  0x26   :  { %99 = vlog2.f32 %v58_v11  ;;  %v62_v17 = vadd.f32 1.0, %v61_v13  ;;  %vm65_vm1 = vcmp.lt.f32.partialorder %v64_v19, 0.0004427343 }
  0x27   :  { %v54_v20 = vmul.f32 %v94_v8, %v53_v14 }
  0x28   :  { %v63_v23 = vmul.f32 %v96_v9, %v62_v17 }
  0x32   :  { %v98_v21 = vpop.eup %97 }
  0x33   :  { %v100_v24 = vpop.eup %99  ;;  %v51_v26 = vmul.f32 0.6931472, %v98_v21 }
  0x34   :  { %v60_v27 = vmul.f32 0.6931472, %v100_v24 }
  0x35   :  { %v57_v28 = vsel %vm56_vm0, %v54_v20, %v51_v26 }
  0x36   :  { %v66_v29 = vsel %vm65_vm1, %v63_v23, %v60_v27  ;;  %v67_v30 = vadd.f32 %v57_v28, %v39_v22 }
  0x37   :  { %v68_v31 = vadd.f32 %v66_v29, %v40_v25 }
  0x39   :  { %v69_v32 = vadd.f32 %v68_v31, %v67_v30 }
  0x3b   :  { %72 = vst [vmem:[#allocation5] sm:$0xff] %v69_v32 }
  0x3c   :  { %132 = shalt.err (!%p129_p9)
}
  0x3d   :  { %82 = dma.vmem_to_hbm [thread:$0]  %s80_s13, 128, %s166_s1, [#allocation4]  }
  0x3e   :  { %143 = dma.done.wait [#allocation4], 128  }
  0x3f   :  { %144 = vsyncadd [#allocation4], 4294967168 }
  0x40   :  { %86 = vsyncpa [#allocation3], 1 }
  0x41   :  { %87 = vsyncpa [#allocation4], 1 }

</bundles_post_ra>
